<compile_context>
chip_gen: v7x
topology: tpu7x:2x2x1
jax: 0.10.0
libtpu: 0.0.40
codegen_flags: <defaults>
</compile_context>

<pallas_src>
import jax
import jax.numpy as jnp
from jax import lax
from jax.experimental import pallas as pl
from jax.experimental.pallas import tpu as pltpu

N_STATES = 4                        # CartPole-v0 observation dim
N_ACTIONS = 2                       # CartPole-v0 action dim
HIDDEN = 64
FUSED_HIDDEN = 2 * HIDDEN           # 128: action hidden | value hidden
OUT_LANES = 128                     # lane-dense output width
W2_ROW0 = 8                         # sublane(8)-aligned start row of W2 in slab
PACK_ROWS = W2_ROW0 + FUSED_HIDDEN  # 136 rows in packed parameter slab

# Auto path-selection policy (VMEM guard + step-overhead amortisation).
UNTILED_MAX_B = 8192                # ~8.5 MiB VMEM -> safe under v5e 16 MiB scoped
DEFAULT_BATCH_BLOCK = 2048          # ~1 MiB in + 1 MiB out per block (x2 buffers)


# ----------------------------- kernel ---------------------------------------
def net_kernel(x_ref, p_ref, out_ref):
    x = x_ref[...]                                       # [TB, 4]

    b1 = p_ref[N_STATES:N_STATES + 1, :]                 # [1, 128]
    b2 = p_ref[N_STATES + 1:N_STATES + 2, :]             # [1, 128]
    w2 = p_ref[W2_ROW0:W2_ROW0 + FUSED_HIDDEN, :]        # [128, 128] block-diag

    # Layer 1 on the VPU: with K=4 an MXU pass would use <4% of the array yet
    # cost a full vmatmul push stream.  Four broadcast FMAs instead (exact f32).
    h = x[:, 0:1] * p_ref[0:1, :] + b1                   # [TB, 128]
    for k in range(1, N_STATES):
        h = h + x[:, k:k + 1] * p_ref[k:k + 1, :]
    h = jnp.maximum(h, 0.0)                              # ReLU

    # Layer 2 on the MXU.
    z = jnp.dot(h, w2, preferred_element_type=jnp.float32) + b2   # [TB, 128]

    # Lanes 0/1 of z hold differenced action logits, so a lane-wise sigmoid is
    # exactly the 2-class softmax.  tanh form: one EUP op + a VPU affine (no
    # full-width divide).  Lane 2 holds the value; lanes 3..127 are zero.
    col = lax.broadcasted_iota(jnp.int32, z.shape, 1)
    probs = 0.5 * jnp.tanh(0.5 * z) + 0.5
    out_ref[...] = jnp.where(col < N_ACTIONS, probs, z)


# ----------------------------- wrapper ---------------------------------------
def _cost_estimate(rows):
    # Count the 128-lane padding of the (B,4) input / (B,128) output honestly.
    return pl.CostEstimate(
        flops=2 * rows * (N_STATES * FUSED_HIDDEN + FUSED_HIDDEN * OUT_LANES),
        transcendentals=rows * OUT_LANES,
        bytes_accessed=4 * (rows * OUT_LANES        # padded input tiles
                            + PACK_ROWS * OUT_LANES  # param slab
                            + rows * OUT_LANES),     # output
    )


def net_forward(x, packed_params, *, batch_block=None):
    """Returns (act [B, 2], val [B, 1]) from states x [B, 4]."""
    B = x.shape[0]

    if batch_block is None:
        # VMEM guard / pipelining guard: small & medium batches stay on the
        # single-block path (no grid overhead, no exposed per-step param DMA);
        # only genuinely large batches get a tiled grid with big blocks.
        batch_block = 0 if B <= UNTILED_MAX_B else DEFAULT_BATCH_BLOCK

    if batch_block <= 0 or batch_block >= B:
        # Single full-block call.
        out = pl.pallas_call(
            net_kernel,
            out_shape=jax.ShapeDtypeStruct((B, OUT_LANES), jnp.float32),
            in_specs=[pl.BlockSpec(memory_space=pltpu.VMEM),
                      pl.BlockSpec(memory_space=pltpu.VMEM)],
            out_specs=pl.BlockSpec(memory_space=pltpu.VMEM),
            cost_estimate=_cost_estimate(B),
        )(x, packed_params)
        return out[:, :N_ACTIONS], out[:, N_ACTIONS:N_ACTIONS + 1]

    # Batch-tiled path: pad B up to a multiple of the (sublane-aligned) block.
    batch_block = max(8, (batch_block // 8) * 8)
    b_pad = ((B + batch_block - 1) // batch_block) * batch_block
    xp = x if b_pad == B else jnp.pad(x, ((0, b_pad - B), (0, 0)))
    grid = (b_pad // batch_block,)

    out = pl.pallas_call(
        net_kernel,
        out_shape=jax.ShapeDtypeStruct((b_pad, OUT_LANES), jnp.float32),
        grid=grid,
        in_specs=[pl.BlockSpec((batch_block, N_STATES), lambda i: (i, 0)),
                  pl.BlockSpec((PACK_ROWS, OUT_LANES), lambda i: (0, 0))],
        out_specs=pl.BlockSpec((batch_block, OUT_LANES), lambda i: (i, 0)),
        compiler_params=pltpu.CompilerParams(
            dimension_semantics=("parallel",)),
        cost_estimate=_cost_estimate(b_pad),
    )(xp, packed_params)
    return out[:B, :N_ACTIONS], out[:B, N_ACTIONS:N_ACTIONS + 1]


# ----------------------------- params ---------------------------------------
def init_linear(key, fan_in, fan_out):
    # Mimic torch.nn.Linear default init: U(-1/sqrt(fan_in), 1/sqrt(fan_in)).
    kw, kb = jax.random.split(key)
    bound = 1.0 / jnp.sqrt(float(fan_in))
    w = jax.random.uniform(kw, (fan_in, fan_out), jnp.float32, -bound, bound)
    b = jax.random.uniform(kb, (1, fan_out), jnp.float32, -bound, bound)
    return w, b


def init_params(key):
    k1, k2, k3, k4 = jax.random.split(key, 4)
    w1a, b1a = init_linear(k1, N_STATES, HIDDEN)
    w2a, b2a = init_linear(k2, HIDDEN, N_ACTIONS)
    w1v, b1v = init_linear(k3, N_STATES, HIDDEN)
    w2v, b2v = init_linear(k4, HIDDEN, 1)
    return (w1a, b1a, w2a, b2a, w1v, b1v, w2v, b2v)


def pack_params(params):
    """One-time packing of the 8 tensors into a single [136, 128] slab.

    Rows:
      0:4    fused first-layer weight  [w1a | w1v]          (4 x 128)
      4      fused first-layer bias    [b1a | b1v]          (1 x 128)
      5      fused second-layer bias   [b2a_diff, b2v, 0..] (1 x 128)
      6:8    zero padding (sublane alignment)
      8:136  fused block-diagonal second-layer weight       (128 x 128)
             rows 0:64   cols 0:2 -> differenced action weights
             rows 64:128 col 2    -> value weights, rest zero.
    """
    (w1a, b1a, w2a, b2a, w1v, b1v, w2v, b2v) = params
    assert N_ACTIONS == 2, "differenced-logit/sigmoid packing assumes 2 actions"

    w1 = jnp.concatenate([w1a, w1v], axis=1)                       # [4, 128]
    b1 = jnp.concatenate([b1a, b1v], axis=1)                       # [1, 128]

    # Differenced action logits: col0 -> l0-l1, col1 -> l1-l0.
    w2a_d = jnp.concatenate([w2a[:, 0:1] - w2a[:, 1:2],
                             w2a[:, 1:2] - w2a[:, 0:1]], axis=1)   # [64, 2]
    b2a_d = jnp.concatenate([b2a[:, 0:1] - b2a[:, 1:2],
                             b2a[:, 1:2] - b2a[:, 0:1]], axis=1)   # [1, 2]

    w2 = jnp.zeros((FUSED_HIDDEN, OUT_LANES), jnp.float32)
    w2 = w2.at[:HIDDEN, 0:N_ACTIONS].set(w2a_d)
    w2 = w2.at[HIDDEN:, N_ACTIONS:N_ACTIONS + 1].set(w2v)

    b2 = jnp.zeros((1, OUT_LANES), jnp.float32)
    b2 = b2.at[:, 0:N_ACTIONS].set(b2a_d)
    b2 = b2.at[:, N_ACTIONS:N_ACTIONS + 1].set(b2v)

    slab = jnp.zeros((PACK_ROWS, OUT_LANES), jnp.float32)
    slab = slab.at[0:N_STATES, :].set(w1)
    slab = slab.at[N_STATES:N_STATES + 1, :].set(b1)
    slab = slab.at[N_STATES + 1:N_STATES + 2, :].set(b2)
    slab = slab.at[W2_ROW0:W2_ROW0 + FUSED_HIDDEN, :].set(w2)
    return slab


# ----------------------------- reference -------------------------------------
def reference_forward(x, params):
    (w1a, b1a, w2a, b2a, w1v, b1v, w2v, b2v) = params
    h_a = jnp.maximum(x @ w1a + b1a, 0.0)
    act = jax.nn.softmax(h_a @ w2a + b2a, axis=-1)
    h_v = jnp.maximum(x @ w1v + b1v, 0.0)
    val = h_v @ w2v + b2v
    return act, val


if __name__ == "__main__":
    key = jax.random.PRNGKey(0)
    kp, kx = jax.random.split(key)
    params = init_params(kp)
    packed = pack_params(params)

    # Small batch (launch-latency regime): auto-selects single full-block call.
    B = 8
    x = jax.random.normal(kx, (B, N_STATES), jnp.float32)
    act, val = net_forward(x, packed)
    jax.block_until_ready((act, val))

    act_ref, val_ref = reference_forward(x, params)
    assert act.shape == (B, N_ACTIONS) and val.shape == (B, 1)
    assert jnp.allclose(act, act_ref, atol=1e-5, rtol=1e-5)
    assert jnp.allclose(val, val_ref, atol=1e-5, rtol=1e-5)
    assert jnp.allclose(jnp.sum(act, axis=-1), 1.0, atol=1e-5)

    # Larger, non-multiple batch: exercise the tiled path explicitly with
    # enough grid steps (8) to pipeline, plus the padding/slicing logic.
    B2 = 2000
    x2 = jax.random.normal(jax.random.PRNGKey(1), (B2, N_STATES), jnp.float32)
    act2, val2 = net_forward(x2, packed, batch_block=256)
    jax.block_until_ready((act2, val2))
    act2_ref, val2_ref = reference_forward(x2, params)
    assert act2.shape == (B2, N_ACTIONS) and val2.shape == (B2, 1)
    assert jnp.allclose(act2, act2_ref, atol=1e-5, rtol=1e-5)
    assert jnp.allclose(val2, val2_ref, atol=1e-5, rtol=1e-5)
    assert jnp.allclose(jnp.sum(act2, axis=-1), 1.0, atol=1e-5)

    print("KERNEL_OK")
</pallas_src>

<mosaic_0001>
module attributes {stable_mosaic.version = 11 : i64} {
  func.func @net_kernel(%arg0: memref<8x4xf32, #tpu.memory_space<vmem>>, %arg1: memref<136x128xf32, #tpu.memory_space<vmem>>, %arg2: memref<8x128xf32, #tpu.memory_space<vmem>>) attributes {dimension_semantics = [], scalar_prefetch = 0 : i64, scratch_operands = 0 : i64, tpu.core_type = #tpu.core_type<tc>} {
    %c0 = arith.constant 0 : index
    %c0_0 = arith.constant 0 : index
    %0 = vector.load %arg0[%c0, %c0_0] : memref<8x4xf32, #tpu.memory_space<vmem>>, vector<8x4xf32>
    %c4 = arith.constant 4 : index
    %c0_1 = arith.constant 0 : index
    %1 = vector.load %arg1[%c4, %c0_1] : memref<136x128xf32, #tpu.memory_space<vmem>>, vector<1x128xf32>
    %c5 = arith.constant 5 : index
    %c0_2 = arith.constant 0 : index
    %2 = vector.load %arg1[%c5, %c0_2] : memref<136x128xf32, #tpu.memory_space<vmem>>, vector<1x128xf32>
    %c8 = arith.constant 8 : index
    %c0_3 = arith.constant 0 : index
    %3 = vector.load %arg1[%c8, %c0_3] : memref<136x128xf32, #tpu.memory_space<vmem>>, vector<128x128xf32>
    %4 = vector.extract_strided_slice %0 {offsets = [0, 0], sizes = [8, 1], strides = [1, 1]} : vector<8x4xf32> to vector<8x1xf32>
    %c0_4 = arith.constant 0 : index
    %c0_5 = arith.constant 0 : index
    %5 = vector.load %arg1[%c0_4, %c0_5] : memref<136x128xf32, #tpu.memory_space<vmem>>, vector<1x128xf32>
    %6 = vector.broadcast %4 : vector<8x1xf32> to vector<8x128xf32>
    %7 = vector.broadcast %5 : vector<1x128xf32> to vector<8x128xf32>
    %8 = arith.mulf %6, %7 : vector<8x128xf32>
    %9 = vector.broadcast %1 : vector<1x128xf32> to vector<8x128xf32>
    %10 = arith.addf %8, %9 : vector<8x128xf32>
    %11 = vector.extract_strided_slice %0 {offsets = [0, 1], sizes = [8, 1], strides = [1, 1]} : vector<8x4xf32> to vector<8x1xf32>
    %c1 = arith.constant 1 : index
    %c0_6 = arith.constant 0 : index
    %12 = vector.load %arg1[%c1, %c0_6] : memref<136x128xf32, #tpu.memory_space<vmem>>, vector<1x128xf32>
    %13 = vector.broadcast %11 : vector<8x1xf32> to vector<8x128xf32>
    %14 = vector.broadcast %12 : vector<1x128xf32> to vector<8x128xf32>
    %15 = arith.mulf %13, %14 : vector<8x128xf32>
    %16 = arith.addf %10, %15 : vector<8x128xf32>
    %17 = vector.extract_strided_slice %0 {offsets = [0, 2], sizes = [8, 1], strides = [1, 1]} : vector<8x4xf32> to vector<8x1xf32>
    %c2 = arith.constant 2 : index
    %c0_7 = arith.constant 0 : index
    %18 = vector.load %arg1[%c2, %c0_7] : memref<136x128xf32, #tpu.memory_space<vmem>>, vector<1x128xf32>
    %19 = vector.broadcast %17 : vector<8x1xf32> to vector<8x128xf32>
    %20 = vector.broadcast %18 : vector<1x128xf32> to vector<8x128xf32>
    %21 = arith.mulf %19, %20 : vector<8x128xf32>
    %22 = arith.addf %16, %21 : vector<8x128xf32>
    %23 = vector.extract_strided_slice %0 {offsets = [0, 3], sizes = [8, 1], strides = [1, 1]} : vector<8x4xf32> to vector<8x1xf32>
    %c3 = arith.constant 3 : index
    %c0_8 = arith.constant 0 : index
    %24 = vector.load %arg1[%c3, %c0_8] : memref<136x128xf32, #tpu.memory_space<vmem>>, vector<1x128xf32>
    %25 = vector.broadcast %23 : vector<8x1xf32> to vector<8x128xf32>
    %26 = vector.broadcast %24 : vector<1x128xf32> to vector<8x128xf32>
    %27 = arith.mulf %25, %26 : vector<8x128xf32>
    %28 = arith.addf %22, %27 : vector<8x128xf32>
    %cst = arith.constant 0.000000e+00 : f32
    %29 = vector.broadcast %cst : f32 to vector<8x128xf32>
    %30 = arith.maximumf %28, %29 : vector<8x128xf32>
    %cst_9 = arith.constant dense<0.000000e+00> : vector<8x128xf32>
    %31 = tpu.matmul %30, %3, %cst_9 {dimension_numbers = #tpu.dot_dimension_numbers<[1], [0], [0], [1], [0, 0, 1, 1], [], []>} : vector<8x128xf32>, vector<128x128xf32>, vector<8x128xf32> -> vector<8x128xf32>
    %32 = vector.broadcast %2 : vector<1x128xf32> to vector<8x128xf32>
    %33 = arith.addf %31, %32 : vector<8x128xf32>
    %34 = tpu.iota {dimensions = array<i32: 1>} : vector<8x128xi32>
    %cst_10 = arith.constant 5.000000e-01 : f32
    %35 = vector.broadcast %cst_10 : f32 to vector<8x128xf32>
    %36 = arith.mulf %35, %33 : vector<8x128xf32>
    %37 = math.tanh %36 : vector<8x128xf32>
    %cst_11 = arith.constant 5.000000e-01 : f32
    %38 = vector.broadcast %cst_11 : f32 to vector<8x128xf32>
    %39 = arith.mulf %38, %37 : vector<8x128xf32>
    %cst_12 = arith.constant 5.000000e-01 : f32
    %40 = vector.broadcast %cst_12 : f32 to vector<8x128xf32>
    %41 = arith.addf %39, %40 : vector<8x128xf32>
    %c2_i32 = arith.constant 2 : i32
    %42 = vector.broadcast %c2_i32 : i32 to vector<8x128xi32>
    %43 = arith.cmpi slt, %34, %42 : vector<8x128xi32>
    %44 = arith.select %43, %41, %33 : vector<8x128xi1>, vector<8x128xf32>
    %c0_13 = arith.constant 0 : index
    %c0_14 = arith.constant 0 : index
    %45 = vector.load %arg2[%c0_13, %c0_14] : memref<8x128xf32, #tpu.memory_space<vmem>>, vector<8x128xf32>
    tpu.vector_store %arg2[%c0_13, %c0_14], %44 {strides = array<i32>} : memref<8x128xf32, #tpu.memory_space<vmem>>, vector<8x128xf32>,
    return
  }
}

</mosaic_0001>

<bundles_post_ra>
// kernel: tpu_custom_call.1
= control target key start
LH: loop header
LB: loop body
LE: loop exit
PB: predicated region body
PF: predicated region fallthrough
CT: control target
= control target key end

     0   :  { %7 = vsyncpa [#allocation3], 0  ;;  %s394_s0 = inlined_call_operand.vmem [shape: f32[8,4], index: 0, kind: input, shape index: {}]   ;;  %s395_s1 = inlined_call_operand.hbm [shape: f32[136,128], index: 1, kind: input, shape index: {}]   ;;  %s396_s2 = inlined_call_operand.hbm [shape: f32[8,128], index: 2, kind: output, shape index: {}]  }
   0x1   :  { %8 = vsyncpa [#allocation4], 0  ;;  %s341_s9 = smov [#allocation2]   ;;  %s293_s13 = scalar_lea.hbm %s395_s1, 2176 }
   0x2   :  { %s16_s10 = sshll.u32 %s341_s9, 4  ;;  %p294_p0 = scmp.ne.s32.totalorder %s395_s1, %s293_s13  ;;  %s17_s10 = int_to_ptr.vmem [resolvable:$true] %s16_s10 }
   0x3   :  { %p297_p1 = scmp.lt.u32.totalorder %s293_s13, %s395_s1 }
   0x5   :  { %p299_p2 = pnand %p297_p1, %p294_p0 }
   0x7   :  { %302 = shalt.err (!%p299_p2)
}
   0x8   :  { %s303_s18 = scalar_lea.vmem %s17_s10, 2176  ;;  %p308_p4 = scmp.lt.s32.totalorder %s17_s10, %s17_s10 }
   0x9   :  { %p304_p3 = scmp.ne.s32.totalorder %s17_s10, %s303_s18  ;;  %p309_p5 = scmp.lt.s32.totalorder %s303_s18, %s303_s18 }
   0xb   :  { %p310_p6 = por %p309_p5, %p308_p4 }
   0xd   :  { %p311_p7 = pnand %p310_p6, %p304_p3 }
   0xf   :  { %314 = shalt.err (!%p311_p7)
}
  0x10   :  { %s342_s19 = smov 128   ;;  %s343_s20 = smov 8  }
  0x11   :  { %22 = dma.hbm_to_vmem [thread:$0]  %s395_s1, 2176, %s17_s10, [#allocation3], %s342_s19, %s342_s19, %s343_s20  }
  0x12   :  { %337 = dma.done.wait [#allocation3], 2176  }
  0x13   :  { %338 = vsyncadd [#allocation3], 4294965120  ;;  %v344_v0 = vmov 0   ;;  %v345_v1 = vmov 2   ;;  %v346_v2 = vmov 0.0|0.0   ;;  %v26_v3 = vld [vmem:[%s394_s0] sm:$0xff]  ;;  %v169_v54 = vlaneseq }
  0x14   :  { %286 = vset.pattern.permute.xlu0 %v344_v0  ;;  %288 = vset.pattern.permute.xlu1 %v345_v1  ;;  %v29_v4 = vld [vmem:[#allocation2 + $0x8] sm:$0xff]  ;;  %v30_v5 = vld [vmem:[#allocation2 + $0x10] sm:$0xff]  ;;  %v31_v7 = vld [vmem:[#allocation2 + $0x18] sm:$0xff]  ;;  %v347_v12 = vmov 1   ;;  %v348_v13 = vmov 3   ;;  %vm349_vm0 = vmmov 0  }
  0x15   :  { %251 = vmatprep.subr.bf16.mxu0 %v346_v2  ;;  %48 = vperm.xlu0 %286, %v26_v3   ;;  %v252_v6 = vpack.c.bf16 %v30_v5, %v29_v4  ;;  %v32_v8 = vld [vmem:[#allocation2 + $0x20] sm:$0xff]  ;;  %v33_v10 = vld [vmem:[#allocation2 + $0x28] sm:$0xff]  ;;  %v34_v11 = vld [vmem:[#allocation2 + $0x30] sm:$0xff]  ;;  %v350_v21 = vmov 0.0   ;;  %v170_v55 = vand.u32 127, %v169_v54  ;;  %s351_s0 = smov [#allocation5]  }
  0x16   :  { %74 = vperm.xlu1 %288, %v26_v3   ;;  %v255_v9 = vpack.c.bf16 %v32_v8, %v31_v7  ;;  %v258_v14 = vpack.c.bf16 %v34_v11, %v33_v10  ;;  %v35_v15 = vld [vmem:[#allocation2 + $0x38] sm:$0xff]  ;;  %v36_v16 = vld [vmem:[#allocation2 + $0x40] sm:$0xff]  ;;  %v37_v18 = vld [vmem:[#allocation2 + $0x48] sm:$0xff]  ;;  %248 = vmatprep.mubr.msk.f32.mxu0 %vm349_vm0, %v350_v21  ;;  %s184_s1 = sshll.u32 %s351_s0, 4  ;;  %s185_s1 = int_to_ptr.vmem [resolvable:$true] %s184_s1 }
  0x17   :  { %253 = vmatpush3.bf16.msra.mxu0 %v252_v6  ;;  %v261_v17 = vpack.c.bf16 %v36_v16, %v35_v15  ;;  %v38_v19 = vld [vmem:[#allocation2 + $0x50] sm:$0xff]  ;;  %v39_v22 = vld [vmem:[#allocation2 + $0x58] sm:$0xff]  ;;  %v40_v23 = vld [vmem:[#allocation2 + $0x60] sm:$0xff]  ;;  %vm175_vm1 = vcmp.lt.s32.totalorder %v170_v55, 2  ;;  %s315_s25 = scalar_lea.vmem %s185_s1, 128  ;;  %p320_p9 = scmp.lt.s32.totalorder %s185_s1, %s185_s1 }
  0x18   :  { %254 = vmatprep.subr.bf16.mxu0 %v346_v2  ;;  %v264_v20 = vpack.c.bf16 %v38_v19, %v37_v18  ;;  %v267_v24 = vpack.c.bf16 %v40_v23, %v39_v22  ;;  %v41_v25 = vld [vmem:[#allocation2 + $0x68] sm:$0xff]  ;;  %v42_v26 = vld [vmem:[#allocation2 + $0x70] sm:$0xff]  ;;  %v43_v28 = vld [vmem:[#allocation2 + $0x78] sm:$0xff]  ;;  %p316_p8 = scmp.ne.s32.totalorder %s185_s1, %s315_s25  ;;  %p321_p10 = scmp.lt.s32.totalorder %s315_s25, %s315_s25 }
  0x19   :  { %287 = vset.pattern.permute.xlu0 %v347_v12  ;;  %v270_v27 = vpack.c.bf16 %v42_v26, %v41_v25  ;;  %v44_v29 = vld [vmem:[#allocation2 + $0x80] sm:$0xff] }
  0x1a   :  { %289 = vset.pattern.permute.xlu1 %v348_v13  ;;  %63 = vperm.xlu0 %287, %v26_v3   ;;  %v273_v30 = vpack.c.bf16 %v44_v29, %v43_v28  ;;  %v193_v31 = vld [vmem:[#allocation2] ss:$0 sm:$0xff]  ;;  %v194_v35 = vld [vmem:[#allocation2 + $0x4] ss:$0 sm:$0xff]  ;;  %v195_v36 = vld [vmem:[#allocation2 + $0x1] ss:$0 sm:$0xff]  ;;  %p322_p11 = por %p321_p10, %p320_p9 }
  0x1b   :  { %85 = vperm.xlu1 %289, %v26_v3   ;;  %256 = vmatpush3.bf16.msra.mxu0 %v255_v9  ;;  %v196_v37 = vld [vmem:[#allocation2 + $0x2] ss:$0 sm:$0xff]  ;;  %v197_v39 = vld [vmem:[#allocation2 + $0x3] ss:$0 sm:$0xff]  ;;  %v198_v49 = vld [vmem:[#allocation2 + $0x5] ss:$0 sm:$0xff] }
  0x1c   :  { %257 = vmatprep.subr.bf16.mxu0 %v346_v2  ;;  %p323_p12 = pnand %p322_p11, %p316_p8 }
  0x1e   :  { %290 = vset.pattern.permute.xlu0 %v348_v13 }
  0x1f   :  { %259 = vmatpush3.bf16.msra.mxu0 %v258_v14 }
  0x20   :  { %260 = vmatprep.subr.bf16.mxu0 %v346_v2 }
  0x23   :  { %262 = vmatpush3.bf16.msra.mxu0 %v261_v17 }
  0x24   :  { %263 = vmatprep.subr.bf16.mxu0 %v346_v2 }
  0x27   :  { %265 = vmatpush3.bf16.msra.mxu0 %v264_v20 }
  0x28   :  { %266 = vmatprep.subr.bf16.mxu0 %v346_v2 }
  0x2b   :  { %268 = vmatpush3.bf16.msra.mxu0 %v267_v24 }
  0x2c   :  { %269 = vmatprep.subr.bf16.mxu0 %v346_v2 }
  0x2f   :  { %271 = vmatpush3.bf16.msra.mxu0 %v270_v27 }
  0x30   :  { %272 = vmatprep.subr.bf16.mxu0 %v346_v2 }
  0x33   :  { %274 = vmatpush3.bf16.msra.mxu0 %v273_v30 }
  0x94   :  { %v49_v32 = vpop.permute.xlu0 %48 }
  0x95   :  { %v75_v33 = vpop.permute.xlu1 %74  ;;  %v55_v34 = vmul.f32 %v193_v31, %v49_v32 }
  0x96   :  { %v81_v43 = vmul.f32 %v196_v37, %v75_v33 }
  0x97   :  { %v60_v41 = vadd.f32 %v194_v35, %v55_v34 }
  0x99   :  { %v64_v38 = vpop.permute.xlu0 %63 }
  0x9a   :  { %v86_v40 = vpop.permute.xlu1 %85  ;;  %v70_v42 = vmul.f32 %v195_v36, %v64_v38 }
  0x9b   :  { %v92_v45 = vmul.f32 %v197_v39, %v86_v40 }
  0x9c   :  { %v71_v44 = vadd.f32 %v70_v42, %v60_v41 }
  0x9e   :  { %v82_v46 = vadd.f32 %v81_v43, %v71_v44 }
  0xa0   :  { %v93_v47 = vadd.f32 %v92_v45, %v82_v46 }
  0xa2   :  { %v94_v48 = vmax.f32 %v93_v47, 0.0 }
  0xa4   :  { %249 = vmatmul.mubr.f32.vlgmr.msra.gmra.mrb[0].mxu0 %v94_v48 }
 0x177   :  { %v165_v50 = vpop.f32.mrb[0].mxu0 }
 0x178   :  { %v166_v51 = vadd.f32 %v198_v49, %v165_v50  ;;  %v250_v52 = vpop.f32.mrb[1].mxu0 }
 0x17a   :  { %v171_v53 = vmul.f32 0.5, %v166_v51 }
 0x17c   :  { %291 = vtanh.f32 %v171_v53 }
 0x186   :  { %v292_v56 = vpop.eup %291 }
 0x187   :  { %v173_v57 = vmul.f32 0.5, %v292_v56 }
 0x189   :  { %v174_v58 = vadd.f32 0.5, %v173_v57 }
 0x18b   :  { %v176_v59 = vsel %vm175_vm1, %v174_v58, %v166_v51 }
 0x18c   :  { %177 = vst [vmem:[#allocation5] sm:$0xff] %v176_v59 }
 0x18d   :  { %326 = shalt.err (!%p323_p12)
}
 0x18e   :  { %s327_s28 = scalar_lea.hbm %s396_s2, 128 }
 0x18f   :  { %p328_p13 = scmp.ne.s32.totalorder %s396_s2, %s327_s28  ;;  %p331_p0 = scmp.lt.u32.totalorder %s327_s28, %s396_s2 }
 0x191   :  { %p333_p1 = pnand %p331_p0, %p328_p13 }
 0x193   :  { %336 = shalt.err (!%p333_p1)
}
 0x194   :  { %187 = dma.vmem_to_hbm [thread:$0]  %s185_s1, 128, %s396_s2, [#allocation4]  }
 0x195   :  { %339 = dma.done.wait [#allocation4], 128  }
 0x196   :  { %340 = vsyncadd [#allocation4], 4294967168 }
 0x197   :  { %191 = vsyncpa [#allocation3], 1 }
 0x198   :  { %192 = vsyncpa [#allocation4], 1 }

</bundles_post_ra>
